<compile_context>
chip_gen: v7x
topology: tpu7x:2x2x1
jax: 0.10.0
libtpu: 0.0.40
codegen_flags: <defaults>
</compile_context>

<pallas_src>
import jax
import jax.numpy as jnp
from jax.experimental import pallas as pl
from jax.experimental.pallas import tpu as pltpu


def additive_attention_kernel(
    q_ref,     # (TB, Q_DIM)          VMEM
    kv_ref,    # (TB, N_KV, KV_DIM)   VMEM
    w1q_ref,   # (Q_DIM, A)           VMEM (resident: constant index_map)
    w1k_ref,   # (KV_DIM, A)          VMEM (resident)
    aux_ref,   # (2, A)               VMEM: row 0 = b1q+b1k, row 1 = w2 row
    slab_ref,  # (TB, OUT_W)          lane-dense packed output
):
    q = q_ref[...]                     # native dtype straight into the MXU
    kv = kv_ref[...]
    tb, n_kv, kv_dim = kv_ref.shape

    bias = aux_ref[0:1, :]             # (1, A)  = b1q + b1k (pre-summed)
    w2_row = aux_ref[1:2, :]           # (1, A)  attn_w_2 weight as a row

    # Query projection (small) + folded bias.
    queries = jnp.dot(q, w1q_ref[...],
                      preferred_element_type=jnp.float32) + bias      # (TB, A)

    # Keys projection as ONE large 2-D matmul (fills the MXU rows).
    kv2d = kv.reshape(tb * n_kv, kv_dim)                              # (TB*N, Dkv)
    keys = jnp.dot(kv2d, w1k_ref[...],
                   preferred_element_type=jnp.float32)                # (TB*N, A)
    keys = keys.reshape(tb, n_kv, -1)                                 # (TB, N, A)

    h = jnp.tanh(queries[:, None, :] + keys)                          # (TB, N, A)

    # attn_w_2 projection (output width 1) as VPU multiply + lane reduce.
    # b2 is omitted: softmax is shift-invariant, so it cannot affect outputs.
    logits = jnp.sum(h * w2_row[None, :, :], axis=-1)                 # (TB, N)

    # Softmax over the kv axis.  Exact reciprocal so rows sum to 1 exactly
    # (approx EUP reciprocal drifted past ~1e-3 on the row sums).
    m = jnp.max(logits, axis=1, keepdims=True)
    e = jnp.exp(logits - m)                                           # (TB, N)
    denom = jnp.sum(e, axis=1, keepdims=True)                         # (TB, 1)
    inv = 1.0 / denom

    attn = e * inv                                                    # (TB, N)

    # context = sum_n attn[:, n] * kv[:, n, :]  (VPU multiply + sublane
    # reduce; avoids M=1 mat-vecs on the MXU).  Normalization shares `inv`.
    ctx = jnp.sum(e[:, :, None] * kv.astype(jnp.float32), axis=1) * inv  # (TB, Dkv)

    # Pack [ctx | attn | zero-pad] into one 128-lane-aligned slab so the
    # store is a single full-width unmasked write per row.
    out_w = slab_ref.shape[1]
    parts = [ctx.astype(jnp.float32), attn.astype(jnp.float32)]
    pad = out_w - (kv_dim + n_kv)
    if pad:
        parts.append(jnp.zeros((tb, pad), jnp.float32))
    slab_ref[...] = jnp.concatenate(parts, axis=-1).astype(slab_ref.dtype)


def additive_attention(query, key_value, params, *, tb=None, compute_dtype=None):
    """query: (B, Q_DIM); key_value: (B, N_KV, KV_DIM) -> (output, attn)."""
    B, q_dim = query.shape
    Bk, n_kv, kv_dim = key_value.shape
    assert B == Bk
    attn_dim = params["w1q"].shape[1]

    # Batch tile: largest power-of-two tile that keeps >= 2 grid steps (so
    # both v7x TensorCores get work and the DMA pipeline is exercised), else
    # the full batch.  Sweep `tb` at production sizes; size it so the
    # double-buffered kv tile is ~0.5-2 MiB and TB*N_KV >= 256 MXU rows,
    # within the per-generation VMEM budget (v7x: 64 MiB per TC).
    if tb is None:
        tb = B
        for cand in (512, 256, 128, 64, 32, 16, 8):
            if B % cand == 0 and B // cand >= 2:
                tb = cand
                break
    assert B % tb == 0, "batch must be divisible by the batch tile"
    grid = (B // tb,)

    # Fold the two Linear biases and pack with the attn_w_2 weight row:
    # one (2, A) resident tile instead of three padded (8,128) tiles + SMEM.
    bias = (params["b1q"] + params["b1k"]).reshape(1, attn_dim)
    w2_row = params["w2"].reshape(1, attn_dim)
    aux = jnp.concatenate([bias, w2_row], axis=0).astype(jnp.float32)   # (2, A)

    w1q, w1k = params["w1q"], params["w1k"]
    if compute_dtype is not None:
        # bf16 inputs halve HBM traffic on the dominant kv stream; matmuls
        # still accumulate in f32 (preferred_element_type) and softmax is f32.
        query = query.astype(compute_dtype)
        key_value = key_value.astype(compute_dtype)
        w1q = w1q.astype(compute_dtype)
        w1k = w1k.astype(compute_dtype)

    # Lane-dense packed output: [ctx | attn | pad] rounded up to 128 lanes.
    out_w = ((kv_dim + n_kv + 127) // 128) * 128

    in_specs = [
        pl.BlockSpec((tb, q_dim), lambda i: (i, 0)),
        pl.BlockSpec((tb, n_kv, kv_dim), lambda i: (i, 0, 0)),
        # Resident params: constant index_maps -> DMA'd once, reused.
        # TODO(synk): pipeline_mode=pl.Buffered(1) here at production sizes to
        # reclaim the unused second buffer on v7x's 64 MiB VMEM.
        pl.BlockSpec((q_dim, attn_dim), lambda i: (0, 0)),
        pl.BlockSpec((kv_dim, attn_dim), lambda i: (0, 0)),
        pl.BlockSpec((2, attn_dim), lambda i: (0, 0)),
    ]
    out_specs = pl.BlockSpec((tb, out_w), lambda i: (i, 0))
    out_shape = jax.ShapeDtypeStruct((B, out_w), jnp.float32)

    slab = pl.pallas_call(
        additive_attention_kernel,
        grid=grid,
        in_specs=in_specs,
        out_specs=out_specs,
        out_shape=out_shape,
        compiler_params=pltpu.CompilerParams(
            dimension_semantics=("parallel",),
            vmem_limit_bytes=32 * 1024 * 1024,   # safe on v5e/v6e/v7x budgets
        ),
    )(query, key_value, w1q, w1k, aux)

    # Unpack the lane-dense slab back into the module's output shapes.
    output = slab[:, :kv_dim]
    attn = slab[:, kv_dim:kv_dim + n_kv]
    return output, attn


def make_params(key, q_dim, kv_dim, attn_dim):
    """Deterministic synthetic parameters (PyTorch Linear shapes, pre-transposed)."""
    k1, k2, k3, k4, k5, k6 = jax.random.split(key, 6)
    return {
        # nn.Linear(query_dim, attn_dim): weight (attn, q) -> stored as (q, attn)
        "w1q": jax.random.normal(k1, (q_dim, attn_dim), jnp.float32) * 0.1,
        "b1q": jax.random.normal(k2, (1, attn_dim), jnp.float32) * 0.1,
        # nn.Linear(key_dim, attn_dim)
        "w1k": jax.random.normal(k3, (kv_dim, attn_dim), jnp.float32) * 0.1,
        "b1k": jax.random.normal(k4, (1, attn_dim), jnp.float32) * 0.1,
        # nn.Linear(attn_dim, 1)
        "w2": jax.random.normal(k5, (attn_dim, 1), jnp.float32) * 0.1,
        "b2": jax.random.normal(k6, (1, 1), jnp.float32) * 0.1,
    }


def reference(query, key_value, p):
    queries = query @ p["w1q"] + p["b1q"]                 # (B, A)
    keys = jnp.einsum("bnd,da->bna", key_value, p["w1k"]) + p["b1k"][None]
    h = jnp.tanh(queries[:, None, :] + keys)
    logits = jnp.einsum("bna,ao->bno", h, p["w2"])[:, :, 0] + p["b2"][0, 0]
    attn = jax.nn.softmax(logits, axis=1)
    out = jnp.einsum("bn,bnd->bd", attn, key_value)
    return out, attn


if __name__ == "__main__":
    B, Q_DIM, KV_DIM, N_KV, ATTN_DIM = 16, 16, 32, 8, 32

    key = jax.random.PRNGKey(0)
    kq, kkv, kp = jax.random.split(key, 3)
    query = jax.random.normal(kq, (B, Q_DIM), jnp.float32)
    key_value = jax.random.normal(kkv, (B, N_KV, KV_DIM), jnp.float32)
    params = make_params(kp, Q_DIM, KV_DIM, ATTN_DIM)

    # Default tb -> 8, grid of 2 batch tiles (pipelined + both v7x TCs busy).
    out, attn = additive_attention(query, key_value, params)
    out, attn = jax.block_until_ready((out, attn))

    ref_out, ref_attn = reference(query, key_value, params)
    assert out.shape == (B, KV_DIM) and attn.shape == (B, N_KV)
    assert jnp.allclose(out, ref_out, atol=2e-3, rtol=2e-3)
    assert jnp.allclose(attn, ref_attn, atol=2e-3, rtol=2e-3)
    # Exact reciprocal in the kernel -> rows sum to 1 to f32 precision.
    assert jnp.allclose(jnp.sum(attn, axis=1), 1.0, atol=1e-3)

    print("KERNEL_OK")
</pallas_src>

<mosaic_0001>
module attributes {stable_mosaic.version = 11 : i64} {
  func.func @additive_attention_kernel(%arg0: i32, %arg1: memref<8x16xf32, #tpu.memory_space<vmem>>, %arg2: memref<8x8x32xf32, #tpu.memory_space<vmem>>, %arg3: memref<16x32xf32, #tpu.memory_space<vmem>>, %arg4: memref<32x32xf32, #tpu.memory_space<vmem>>, %arg5: memref<2x32xf32, #tpu.memory_space<vmem>>, %arg6: memref<8x128xf32, #tpu.memory_space<vmem>>) attributes {dimension_semantics = [#tpu.dimension_semantics<parallel>], iteration_bounds = array<i64: 2>, scalar_prefetch = 0 : i64, scratch_operands = 0 : i64, tpu.core_type = #tpu.core_type<tc>, window_params = [{transform_indices = @transform_0, window_bounds = array<i64: 8, 16>}, {transform_indices = @transform_1, window_bounds = array<i64: 8, 8, 32>}, {pipeline_mode = #tpu.pipeline_mode<synchronous>, transform_indices = @transform_2, window_bounds = array<i64: 16, 32>}, {pipeline_mode = #tpu.pipeline_mode<synchronous>, transform_indices = @transform_3, window_bounds = array<i64: 32, 32>}, {pipeline_mode = #tpu.pipeline_mode<synchronous>, transform_indices = @transform_4, window_bounds = array<i64: 2, 32>}, {transform_indices = @transform_5, window_bounds = array<i64: 8, 128>}]} {
    %c0 = arith.constant 0 : index
    %c0_0 = arith.constant 0 : index
    %0 = vector.load %arg1[%c0, %c0_0] : memref<8x16xf32, #tpu.memory_space<vmem>>, vector<8x16xf32>
    %c0_1 = arith.constant 0 : index
    %c0_2 = arith.constant 0 : index
    %c0_3 = arith.constant 0 : index
    %1 = vector.load %arg2[%c0_1, %c0_2, %c0_3] : memref<8x8x32xf32, #tpu.memory_space<vmem>>, vector<8x8x32xf32>
    %c0_4 = arith.constant 0 : index
    %c0_5 = arith.constant 0 : index
    %2 = vector.load %arg5[%c0_4, %c0_5] : memref<2x32xf32, #tpu.memory_space<vmem>>, vector<1x32xf32>
    %c1 = arith.constant 1 : index
    %c0_6 = arith.constant 0 : index
    %3 = vector.load %arg5[%c1, %c0_6] : memref<2x32xf32, #tpu.memory_space<vmem>>, vector<1x32xf32>
    %c0_7 = arith.constant 0 : index
    %c0_8 = arith.constant 0 : index
    %4 = vector.load %arg3[%c0_7, %c0_8] : memref<16x32xf32, #tpu.memory_space<vmem>>, vector<16x32xf32>
    %cst = arith.constant dense<0.000000e+00> : vector<8x32xf32>
    %5 = tpu.matmul %0, %4, %cst {dimension_numbers = #tpu.dot_dimension_numbers<[1], [0], [0], [1], [0, 0, 1, 1], [], []>} : vector<8x16xf32>, vector<16x32xf32>, vector<8x32xf32> -> vector<8x32xf32>
    %6 = vector.broadcast %2 : vector<1x32xf32> to vector<8x32xf32>
    %7 = arith.addf %5, %6 : vector<8x32xf32>
    %8 = vector.shape_cast %1 : vector<8x8x32xf32> to vector<64x32xf32>
    %c0_9 = arith.constant 0 : index
    %c0_10 = arith.constant 0 : index
    %9 = vector.load %arg4[%c0_9, %c0_10] : memref<32x32xf32, #tpu.memory_space<vmem>>, vector<32x32xf32>
    %cst_11 = arith.constant dense<0.000000e+00> : vector<64x32xf32>
    %10 = tpu.matmul %8, %9, %cst_11 {dimension_numbers = #tpu.dot_dimension_numbers<[1], [0], [0], [1], [0, 0, 1, 1], [], []>} : vector<64x32xf32>, vector<32x32xf32>, vector<64x32xf32> -> vector<64x32xf32>
    %11 = vector.shape_cast %10 : vector<64x32xf32> to vector<8x8x32xf32>
    %12 = vector.shape_cast %7 : vector<8x32xf32> to vector<8x1x32xf32>
    %13 = vector.broadcast %12 : vector<8x1x32xf32> to vector<8x8x32xf32>
    %14 = arith.addf %13, %11 : vector<8x8x32xf32>
    %15 = math.tanh %14 : vector<8x8x32xf32>
    %16 = vector.shape_cast %3 : vector<1x32xf32> to vector<1x1x32xf32>
    %17 = vector.broadcast %16 : vector<1x1x32xf32> to vector<8x8x32xf32>
    %18 = arith.mulf %15, %17 : vector<8x8x32xf32>
    %cst_12 = arith.constant dense<0.000000e+00> : vector<8x8xf32>
    %19 = vector.multi_reduction <add>, %18, %cst_12 [2] : vector<8x8x32xf32> to vector<8x8xf32>
    %cst_13 = arith.constant dense<0xFF800000> : vector<8xf32>
    %20 = vector.multi_reduction <maximumf>, %19, %cst_13 [1] : vector<8x8xf32> to vector<8xf32>
    %21 = vector.shape_cast %20 : vector<8xf32> to vector<8x1xf32>
    %22 = vector.broadcast %21 : vector<8x1xf32> to vector<8x8xf32>
    %23 = arith.subf %19, %22 : vector<8x8xf32>
    %24 = math.exp %23 : vector<8x8xf32>
    %cst_14 = arith.constant dense<0.000000e+00> : vector<8xf32>
    %25 = vector.multi_reduction <add>, %24, %cst_14 [1] : vector<8x8xf32> to vector<8xf32>
    %26 = vector.shape_cast %25 : vector<8xf32> to vector<8x1xf32>
    %cst_15 = arith.constant 1.000000e+00 : f32
    %27 = vector.broadcast %cst_15 : f32 to vector<8x1xf32>
    %28 = arith.divf %27, %26 : vector<8x1xf32>
    %29 = vector.broadcast %28 : vector<8x1xf32> to vector<8x8xf32>
    %30 = arith.mulf %24, %29 : vector<8x8xf32>
    %31 = vector.shape_cast %24 : vector<8x8xf32> to vector<8x8x1xf32>
    %32 = vector.broadcast %31 : vector<8x8x1xf32> to vector<8x8x32xf32>
    %33 = arith.mulf %32, %1 : vector<8x8x32xf32>
    %cst_16 = arith.constant dense<0.000000e+00> : vector<8x32xf32>
    %34 = vector.multi_reduction <add>, %33, %cst_16 [1] : vector<8x8x32xf32> to vector<8x32xf32>
    %35 = vector.broadcast %28 : vector<8x1xf32> to vector<8x32xf32>
    %36 = arith.mulf %34, %35 : vector<8x32xf32>
    %cst_17 = arith.constant 0.000000e+00 : f32
    %37 = vector.broadcast %cst_17 : f32 to vector<8x88xf32>
    %38 = tpu.concatenate %36, %30, %37 in 1 : vector<8x32xf32>, vector<8x8xf32>, vector<8x88xf32> -> vector<8x128xf32>
    %c0_18 = arith.constant 0 : index
    %c0_19 = arith.constant 0 : index
    %39 = vector.load %arg6[%c0_18, %c0_19] : memref<8x128xf32, #tpu.memory_space<vmem>>, vector<8x128xf32>
    tpu.vector_store %arg6[%c0_18, %c0_19], %38 {strides = array<i32>} : memref<8x128xf32, #tpu.memory_space<vmem>>, vector<8x128xf32>,
    return
  }
  func.func @transform_0(%arg0: i32) -> (i32, i32) {
    %c0_i32 = arith.constant 0 : i32
    %c0_i32_0 = arith.constant 0 : i32
    return %arg0, %c0_i32 : i32, i32
  }
  func.func @transform_1(%arg0: i32) -> (i32, i32, i32) {
    %c0_i32 = arith.constant 0 : i32
    %c0_i32_0 = arith.constant 0 : i32
    %c0_i32_1 = arith.constant 0 : i32
    return %arg0, %c0_i32, %c0_i32_0 : i32, i32, i32
  }
  func.func @transform_2(%arg0: i32) -> (i32, i32) {
    %c0_i32 = arith.constant 0 : i32
    %c0_i32_0 = arith.constant 0 : i32
    %c0_i32_1 = arith.constant 0 : i32
    return %c0_i32, %c0_i32_0 : i32, i32
  }
  func.func @transform_3(%arg0: i32) -> (i32, i32) {
    %c0_i32 = arith.constant 0 : i32
    %c0_i32_0 = arith.constant 0 : i32
    %c0_i32_1 = arith.constant 0 : i32
    return %c0_i32, %c0_i32_0 : i32, i32
  }
  func.func @transform_4(%arg0: i32) -> (i32, i32) {
    %c0_i32 = arith.constant 0 : i32
    %c0_i32_0 = arith.constant 0 : i32
    %c0_i32_1 = arith.constant 0 : i32
    return %c0_i32, %c0_i32_0 : i32, i32
  }
  func.func @transform_5(%arg0: i32) -> (i32, i32) {
    %c0_i32 = arith.constant 0 : i32
    %c0_i32_0 = arith.constant 0 : i32
    return %arg0, %c0_i32 : i32, i32
  }
}

</mosaic_0001>

<bundles_post_ra>
// kernel: tpu_custom_call.1
= control target key start
LH: loop header
LB: loop body
LE: loop exit
PB: predicated region body
PF: predicated region fallthrough
CT: control target
= control target key end

     0   :  { %s2200_s0 = inlined_call_operand.hbm [shape: f32[16,16], index: 0, kind: input, shape index: {}]   ;;  %s2201_s1 = inlined_call_operand.hbm [shape: f32[16,8,32], index: 1, kind: input, shape index: {}]   ;;  %s2202_s2 = inlined_call_operand.hbm [shape: f32[16,32], index: 2, kind: input, shape index: {}]   ;;  %s2203_s3 = inlined_call_operand.hbm [shape: f32[32,32], index: 3, kind: input, shape index: {}]   ;;  %s2204_s4 = inlined_call_operand.vmem [shape: f32[2,32], index: 4, kind: input, shape index: {}]   ;;  %s2205_s5 = inlined_call_operand.hbm [shape: f32[16,128], index: 5, kind: output, shape index: {}]  }
   0x1   :  { %2211 = sst [smem:[#allocation16_spill]] %s2200_s0 }
   0x2   :  { %10 = vsyncpa [#allocation3], 0 }
   0x3   :  { %12 = vsyncpa [#allocation3 + $0x1], 0 }
   0x4   :  { %13 = vsyncpa [#allocation6], 0 }
   0x5   :  { %15 = vsyncpa [#allocation6 + $0x1], 0 }
   0x6   :  { %16 = vsyncpa [#allocation9], 0 }
   0x7   :  { %17 = vsyncpa [#allocation4], 0 }
   0x8   :  { %19 = vsyncpa [#allocation4 + $0x1], 0  ;;  %s1692_s18 = smov 0   ;;  %s1694_s19 = smov 0  }
   0x9   :  { %s1696_s20 = smov 0   ;;  %s1698_s21 = smov 0  }
   0xa LB: > { %s1713_s22 = sadd.s32 4294967295, %s1648_s21   ;;  %s1250_s23 = sadd.s32 4294967294, %s1648_s21   ;;  %s1648_s21 = sphi %s1698_s21, %s2233_s21   ;;  %s1644_s20 = sphi %s1696_s20, %s2232_s20   ;;  %s1640_s19 = sphi %s1694_s19, %s2231_s19   ;;  %s1636_s18 = sphi %s1692_s18, %s2230_s18  }
   0xb   : > { %p45_p0 = scmp.ne.s32.totalorder %s1640_s19, %s1636_s18  ;;  %p2206_p1 = scmp.eq.s32.totalorder %s1713_s22, 0 }
   0xc   : > { %p164_p3 = scmp.eq.s32.totalorder %s1250_s23, 1  ;;  %p1251_p5 = scmp.ge.s32.totalorder %s1648_s21, 1 }
   0xd   : > { %p1722_p4 = por %p2206_p1, %p45_p0  ;;  %p171_p7 = scmp.lt.s32.totalorder %s1648_s21, 3 }
   0xe   : > { %p1727_p6 = por %p164_p3, %p45_p0  ;;  %s1650_s27 = smov [#allocation7]  }
   0xf   : > { %s2212_s24 = scalar_select %p1722_p4, 1, 0 }
  0x10   : > { %s2213_s25 = scalar_select %p1727_p6, 1, 0 }
  0x11   : > { %p1732_p8 = pnand %p1251_p5, %p171_p7  ;;  %s183_s28 = sshll.u32 %s1650_s27, 4  ;;  %s1736_s28 = int_to_ptr.vmem [resolvable:$true] %s183_s28 }
  0x12   : > { %s1651_s30 = smov [#allocation8]   ;;  %s1454_s9 = scalar_lea.hbm %s2202_s2, 256 }
  0x13   : > { %p1353_p9 = pneg %p1732_p8  ;;  %s196_s6 = sshll.u32 %s1651_s30, 4  ;;  %s1747_s6 = int_to_ptr.vmem [resolvable:$true] %s196_s6 }
  0x14   : > { %p1455_p12 = scmp.ne.s32.totalorder %s2202_s2, %s1454_s9  ;;  %p1461_p5 = scmp.lt.u32.totalorder %s1454_s9, %s2202_s2 }
  0x15   : > { %p1743_p11 = pnand %p1353_p9, %p2206_p1 }
  0x17   : > { %p1456_p13 = pneg %p1743_p11 }
  0x19   : > { %p1457_p0 = pnand %p1456_p13, %p1455_p12 }
  0x1b   : > { %p1458_p3 = pneg %p1457_p0 }
  0x1d   : > { %p1463_p7 = pnand %p1461_p5, %p1458_p3 }
  0x1f   : > { %1466 = shalt.err (!%p1463_p7)
}
  0x20   : > { %s1467_s14 = scalar_lea.vmem %s1736_s28, 256  ;;  %p1475_p2 = scmp.lt.s32.totalorder %s1736_s28, %s1736_s28 }
  0x21   : > { %p1468_p9 = scmp.ne.s32.totalorder %s1736_s28, %s1467_s14  ;;  %p1476_p12 = scmp.lt.s32.totalorder %s1467_s14, %s1467_s14 }
  0x23   : > { %p1470_p10 = pnand %p1468_p9, %p1456_p13  ;;  %p1477_p0 = por %p1476_p12, %p1475_p2 }
  0x25   : > { %p1471_p1 = pneg %p1470_p10 }
  0x27   : > { %p1478_p6 = pnand %p1477_p0, %p1471_p1 }
  0x29   : > { %1481 = shalt.err (!%p1478_p6)
}
  0x2a   : > { %s2207_s15 = smov 128   ;;  %s2208_s16 = smov 8  }
  0x2b   : > { %1356 = dma.hbm_to_vmem [thread:$0]  (!%p1743_p11), %s2202_s2, 256, %s1736_s28, [#allocation6], %s2207_s15, %s2207_s15, %s2208_s16  }
  0x2c   : > { %s1482_s7 = scalar_lea.hbm %s2203_s3, 512 }
  0x2d   : > { %p1483_p1 = scmp.ne.s32.totalorder %s2203_s3, %s1482_s7  ;;  %p1489_p10 = scmp.lt.u32.totalorder %s1482_s7, %s2203_s3 }
  0x2f   : > { %p1485_p2 = pnand %p1483_p1, %p1456_p13 }
  0x31   : > { %p1486_p6 = pneg %p1485_p2 }
  0x33   : > { %p1491_p3 = pnand %p1489_p10, %p1486_p6 }
  0x35   : > { %1494 = shalt.err (!%p1491_p3)
}
  0x36   : > { %s1495_s28 = scalar_lea.vmem %s1747_s6, 512  ;;  %p1503_p12 = scmp.lt.s32.totalorder %s1747_s6, %s1747_s6 }
  0x37   : > { %p1496_p5 = scmp.ne.s32.totalorder %s1747_s6, %s1495_s28  ;;  %p1504_p0 = scmp.lt.s32.totalorder %s1495_s28, %s1495_s28 }
  0x39   : > { %p1498_p7 = pnand %p1496_p5, %p1456_p13  ;;  %p1505_p1 = por %p1504_p0, %p1503_p12 }
  0x3b   : > { %p1499_p9 = pneg %p1498_p7 }
  0x3d   : > { %p1506_p2 = pnand %p1505_p1, %p1499_p9 }
  0x3f   : > { %1509 = shalt.err (!%p1506_p2)
}
  0x40   : > { %1359 = dma.hbm_to_vmem [thread:$0]  (!%p1743_p11), %s2203_s3, 512, %s1747_s6, [#allocation9], %s2207_s15, %s2207_s15, %s2208_s16  }
  0x41   : > { %s1808_s29 = sadd.s32 1, %s1648_s21   ;;  %s32_s14 = sadd.s32 1, %s1644_s20 }
  0x42   : > { %s29_s17 = ssub.s32 %s1648_s21, %s1808_s29  ;;  %p39_p13 = scmp.ne.s32.totalorder %s1644_s20, %s1640_s19 }
  0x43   : > { %p30_p6 = scmp.eq.s32.totalorder %s29_s17, 0  ;;  %p40_p10 = scmp.eq.s32.totalorder %s1648_s21, 0 }
  0x44   : > { %p2216_p3 = scmp.eq.s32.totalorder %s1713_s22, 1  ;;  %p1373_p7 = scmp.lt.s32.totalorder %s1648_s21, 2 }
  0x45   : > { %s1824_s27 = scalar_select %p30_p6, %s1644_s20, %s32_s14  }
  0x46   : > { %p1818_p5 = por %p2216_p3, %p39_p13  ;;  %p41_p9 = por %p40_p10, %p39_p13 }
  0x47   : > { %s1827_s30 = sand.u32 1, %s1644_s20   ;;  %s1256_s7 = sshll.u32 %s1648_s21, 7 }
  0x48   : > { %s2217_s23 = scalar_select %p1818_p5, 1, 0 }
  0x49   : > { %s1255_s6 = sshll.u32 %s1827_s30, 3  ;;  %s2218_s0 = sld [smem:[#allocation16_spill]] }
  0x4a   : > { %s217_s11 = scalar_lea.vmem [#allocation2], %s1255_s6  ;;  %p1838_p11 = pnand %p1373_p7, %p41_p9 }
  0x4b   : > { %s224_s28 = sshll.u32 %s217_s11, 4  ;;  %s1257_s13 = sshll.u32 %s1827_s30, 6  ;;  %s1836_s28 = int_to_ptr.vmem [resolvable:$true] %s224_s28 }
  0x4c   : > { %s231_s14 = sand.u32 1, %s1648_s21   ;;  %s214_s17 = scalar_lea.sflag [#allocation3], %s1827_s30 }
  0x4d   : > { %p1512_p0 = pneg %p1838_p11 }
  0x4f   : > { %s1834_s10 = scalar_lea.hbm %s2218_s0, %s1256_s7  ;;  %s1515_s9 = scalar_lea.hbm %s2218_s0, 256 }
  0x50   : > { %s1510_s8 = scalar_lea.hbm %s1834_s10, 128  ;;  %p1516_p13 = scmp.lt.u32.totalorder %s1834_s10, %s2218_s0 }
  0x51   : > { %p1511_p12 = scmp.ne.s32.totalorder %s1834_s10, %s1510_s8  ;;  %p1517_p6 = scmp.lt.u32.totalorder %s1515_s9, %s1510_s8 }
  0x52   : > { %p1519_p3 = scmp.lt.u32.totalorder %s1510_s8, %s1834_s10 }
  0x53   : > { %p1513_p1 = pnand %p1512_p0, %p1511_p12  ;;  %p1518_p10 = por %p1517_p6, %p1516_p13 }
  0x55   : > { %p1514_p2 = pneg %p1513_p1  ;;  %p1520_p7 = por %p1519_p3, %p1518_p10 }
  0x57   : > { %p1521_p9 = pnand %p1520_p7, %p1514_p2 }
  0x59   : > { %1524 = shalt.err (!%p1521_p9)
}
  0x5a   : > { %s1525_s16 = scalar_lea.vmem %s1836_s28, 128  ;;  %s1654_s6 = smov [#allocation2]  }
  0x5b   : > { %p1526_p12 = scmp.ne.s32.totalorder %s1836_s28, %s1525_s16  ;;  %s1530_s7 = sshll.u32 %s1654_s6, 4  ;;  %s1531_s7 = int_to_ptr.vmem [resolvable:$false] %s1530_s7 }
  0x5c   : > { %s1532_s15 = scalar_lea.vmem %s1531_s7, 256  ;;  %p1533_p4 = scmp.lt.s32.totalorder %s1836_s28, %s1531_s7 }
  0x5d   : > { %p1528_p1 = pnand %p1526_p12, %p1512_p0  ;;  %p1534_p13 = scmp.lt.s32.totalorder %s1532_s15, %s1525_s16 }
  0x5f   : > { %p1529_p5 = pneg %p1528_p1  ;;  %p1535_p6 = por %p1534_p13, %p1533_p4 }
  0x61   : > { %p1536_p10 = pnand %p1535_p6, %p1529_p5 }
  0x63   : > { %1539 = shalt.err (!%p1536_p10)
}
  0x64   : > { %1363 = dma.hbm_to_vmem [thread:$0]  (!%p1838_p11), %s1834_s10, 128, %s1836_s28, %s214_s17  }
  0x65   : > { %s235_s8 = scalar_lea.vmem [#allocation5], %s1257_s13  ;;  %s1281_s11 = sshll.u32 %s1648_s21, 10 }
  0x66   : > { %s242_s9 = sshll.u32 %s235_s8, 4  ;;  %s1878_s7 = scalar_lea.hbm %s2201_s1, %s1281_s11  ;;  %s1872_s9 = int_to_ptr.vmem [resolvable:$true] %s242_s9 }
  0x67   : > { %s1882_s15 = scalar_lea.sflag [#allocation6], %s231_s14  ;;  %s1540_s0 = scalar_lea.hbm %s1878_s7, 1024 }
  0x68   : > { %p1541_p4 = scmp.ne.s32.totalorder %s1878_s7, %s1540_s0  ;;  %s1545_s28 = scalar_lea.hbm %s2201_s1, 2048 }
  0x69   : > { %p1546_p3 = scmp.lt.u32.totalorder %s1878_s7, %s2201_s1  ;;  %p1547_p7 = scmp.lt.u32.totalorder %s1545_s28, %s1540_s0 }
  0x6a   : > { %p1543_p5 = pnand %p1541_p4, %p1512_p0  ;;  %p1549_p12 = scmp.lt.u32.totalorder %s1540_s0, %s1878_s7 }
  0x6b   : > { %p1548_p9 = por %p1547_p7, %p1546_p3 }
  0x6c   : > { %p1544_p2 = pneg %p1543_p5 }
  0x6d   : > { %p1550_p1 = por %p1549_p12, %p1548_p9 }
  0x6f   : > { %p1551_p13 = pnand %p1550_p1, %p1544_p2 }
  0x71   : > { %1554 = shalt.err (!%p1551_p13)
}
  0x72   : > { %s1555_s14 = scalar_lea.vmem %s1872_s9, 1024  ;;  %s1655_s8 = smov [#allocation5]  }
  0x73   : > { %p1556_p6 = scmp.ne.s32.totalorder %s1872_s9, %s1555_s14  ;;  %s1560_s11 = sshll.u32 %s1655_s8, 4  ;;  %s1561_s11 = int_to_ptr.vmem [resolvable:$false] %s1560_s11 }
  0x74   : > { %s1562_s6 = scalar_lea.vmem %s1561_s11, 2048  ;;  %p1563_p5 = scmp.lt.s32.totalorder %s1872_s9, %s1561_s11 }
  0x75   : > { %p1558_p10 = pnand %p1556_p6, %p1512_p0  ;;  %p1564_p3 = scmp.lt.s32.totalorder %s1562_s6, %s1555_s14 }
  0x77   : > { %p1559_p4 = pneg %p1558_p10  ;;  %p1565_p7 = por %p1564_p3, %p1563_p5 }
  0x79   : > { %p1566_p9 = pnand %p1565_p7, %p1559_p4 }
  0x7b   : > { %1569 = shalt.err (!%p1566_p9)
}
  0x7c   : > { %s2220_s0 = smov 8   ;;  %s2221_s16 = smov 128  }
  0x7d   : > { %1366 = dma.hbm_to_vmem [thread:$0]  (!%p1838_p11), %s1878_s7, 1024, %s1872_s9, %s1882_s15, %s2221_s16, %s2221_s16, %s2220_s0  }
  0x7e   : > { %254 = sbr.rel (%p1732_p8) target bundleno = 1193 (0x4a9), region = 40  ;;  %s1914_s30 = sand.u32 (!%p1732_p8), 1, %s1640_s19  }
  0x7f   : > { %s1261_s10 = sshll.u32 (!%p1732_p8), %s1914_s30, 3  ;;  %s257_s28 = scalar_lea.sflag (!%p1732_p8), [#allocation3], %s1914_s30 }
  0x80   : > { %s260_s12 = scalar_lea.vmem (!%p1732_p8), [#allocation2], %s1261_s10  ;;  %p2222_p0 = scmp.ne.s32.totalorder (!%p1732_p8), %s2212_s24, 0 }
  0x85   : > { %1615 = dma.done.wait (%p2222_p0), %s257_s28, 128  }
  0x86   : > { %1617 = vsyncadd (%p2222_p0), %s257_s28, 4294967168  ;;  %s265_s26 = sand.u32 1, %s1713_s22   ;;  %s1262_s9 = sshll.u32 %s1914_s30, 6 }
  0x87   : > { %s266_s7 = scalar_lea.sflag [#allocation6], %s265_s26  ;;  %s1926_s15 = scalar_lea.vmem [#allocation5], %s1262_s9 }
  0x88   : > { %1619 = dma.done.wait (%p2222_p0), %s266_s7, 1024  }
  0x89   : > { %1621 = vsyncadd (%p2222_p0), %s266_s7, 4294966272  ;;  %p2223_p8 = scmp.eq.s32.totalorder %s1713_s22, 0 }
  0x8b   : > { %1623 = dma.done.wait (%p2223_p8), [#allocation6], 256   ;;  %p2224_p11 = pmov %p2223_p8 }
  0x8c   : > { %p2225_p2 = pmov %p2223_p8 }
  0x8d   : > { %1625 = vsyncadd (%p2224_p11), [#allocation6], 4294967040 }
  0x8e   : > { %1627 = dma.done.wait (%p2225_p2), [#allocation9], 512   ;;  %p2226_p12 = pmov %p2225_p2 }
  0x8f   : > { %v1656_v0 = vmov 0.0|0.0   ;;  %vm1657_vm0 = vmmov 0   ;;  %v1658_v1 = vmov 0.0   ;;  %v321_v2 = vld [vmem:[#allocation7] sm:$0xff]  ;;  %v322_v3 = vld [vmem:[#allocation7 + $0x8] sm:$0xff]  ;;  %v401_v4 = vld [vmem:[#allocation8] sm:$0xff]  ;;  %v540_v22 = vlaneseq }
  0x90   : > { %1629 = vsyncadd (%p2226_p12), [#allocation9], 4294966784  ;;  %1324 = vmatprep.subr.bf16.mxu0 %v1656_v0  ;;  %1301 = vmatprep.mubr.msk.f32.mxu0 %vm1657_vm0, %v1658_v1  ;;  %vm405_vm1 = vcmask 261120   ;;  %v1325_v5 = vpack.c.bf16 %v322_v3, %v321_v2  ;;  %v402_v6 = vld [vmem:[#allocation8 + $0x8] sm:$0xff]  ;;  %v403_v7 = vld [vmem:[#allocation8 + $0x10] sm:$0xff]  ;;  %vm327_vm2 = vcmask 130048  }
  0x91   : > { %v1327_v8 = vpack.c.bf16 %v402_v6, %v401_v4  ;;  %v404_v9 = vld [vmem:[#allocation8 + $0x18] sm:$0xff]  ;;  %v1941_v10 = vld [vmem:[%s1926_s15 + $0x10] sm:$0xff]  ;;  %v1946_v13 = vld [vmem:[%s1926_s15] sm:$0xff]  ;;  %v1659_v20 = vmov 1966171168   ;;  %v1981_v24 = vshrl.u32 %v540_v22, 7 }
  0x92   : > { %1326 = vmatpush3.bf16.msra.mxu0 %v1325_v5  ;;  %v310_v11 = vld [vmem:[%s260_s12] sm:$0xff]  ;;  %v1331_v12 = vpack.c.bf16 %v404_v9, %v403_v7  ;;  %1315 = vmatprep.mubr.msk.f32.mxu1 %vm405_vm1, %v1941_v10  ;;  %v1954_v15 = vld [vmem:[%s1926_s15 + $0x20] sm:$0xff]  ;;  %v1957_v16 = vld [vmem:[%s1926_s15 + $0x8] sm:$0xff]  ;;  %v538_v21 = vunpack.c.l.s4 %v1659_v20  ;;  %vm719_vm3 = vcmask 1041409   ;;  %vm721_vm4 = vcmask 1042434   ;;  %s1278_s8 = sshll.u32 %s1713_s22, 7 }
  0x93   : > { %1335 = vmatprep.subr.bf16.mxu1 %v1327_v8  ;;  %1328 = vmatprep.subr.bf16.mxu0 %v1327_v8  ;;  %v1951_v14 = vld [vmem:[%s1926_s15 + $0x18] sm:$0xff]  ;;  %v1964_v17 = vld [vmem:[%s1926_s15 + $0x28] sm:$0xff]  ;;  %v1969_v18 = vld [vmem:[%s1926_s15 + $0x30] sm:$0xff]  ;;  %v1988_v32 = vsub.s32 0, %v1981_v24  ;;  %vm723_vm5 = vcmask 1043459   ;;  %vm725_vm6 = vcmask 1044484   ;;  %s2156_s28 = scalar_lea.hbm %s2205_s5, %s1278_s8 }
  0x94   : > { %1337 = vmatpush3.bf16.msra.mxu1 %v1327_v8  ;;  %v1976_v19 = vld [vmem:[%s1926_s15 + $0x38] sm:$0xff]  ;;  %v539_v23 = vunpack.c.0.s8 %v538_v21  ;;  %v1266_v25 = vld [vmem:[%s2204_s4] ss:$0 sm:$0xff]  ;;  %v1276_v4 = vld [vmem:[%s2204_s4 + $0x1] ss:$0 sm:$0xff]  ;;  %vm727_vm7 = vcmask 1045509  }
  0x95   : > { %1302 = vmatmul.mubr.msk.f32.vlgmr.msra.gmra.mrb[0].mxu0 %vm327_vm2, %v310_v11  ;;  %1336 = vmatprep.subr.bf16.mxu1 %v1331_v12  ;;  %vm729_vm8 = vcmask 1046534   ;;  %vm731_vm9 = vcmask 1047559   ;;  %vm734_vm10 = vcmask 64512   ;;  %s308_s11 = scalar_lea.vmem [#allocation10], %s1261_s10  ;;  %vm1121_vm11 = vcmask 326656   ;;  %s1125_s22 = scalar_lea.sflag [#allocation4], %s1914_s30 }
  0x96   : > { %1330 = vmatpush3.bf16.msra.mxu0 %v1327_v8  ;;  %1312 = vmatprep.mubr.msk.f32.mxu0 %vm405_vm1, %v1946_v13  ;;  %v542_v26 = vsub.s32 %v539_v23, %v1981_v24  ;;  %s1138_s6 = sshll.u32 %s308_s11, 4  ;;  %p2227_p13 = scmp.ne.s32.totalorder %s2217_s23, 0  ;;  %s2158_s6 = int_to_ptr.vmem [resolvable:$true] %s1138_s6 }
  0x97   : > { %1332 = vmatprep.subr.bf16.mxu0 %v1331_v12  ;;  %s1570_s10 = scalar_lea.vmem %s2158_s6, 128  ;;  %s1661_s12 = smov [#allocation10]  }
  0x98   : > { %1338 = vmatpush3.bf16.msra.mxu1 %v1331_v12  ;;  %p1571_p1 = scmp.ne.s32.totalorder %s2158_s6, %s1570_s10  ;;  %s1574_s26 = sshll.u32 %s1661_s12, 4  ;;  %s1575_s26 = int_to_ptr.vmem [resolvable:$false] %s1574_s26 }
  0x99   : > { %s1576_s9 = scalar_lea.vmem %s1575_s26, 256  ;;  %p1577_p4 = scmp.lt.s32.totalorder %s2158_s6, %s1575_s26 }
  0x9a   : > { %1334 = vmatpush3.bf16.msra.mxu0 %v1331_v12  ;;  %p1572_p6 = pnand %p1571_p1, %p2227_p13  ;;  %p1578_p5 = scmp.lt.s32.totalorder %s1576_s9, %s1570_s10 }
  0x9b   : > { %1316 = vmatmul.mubr.msk.f32.vlgmr.msra.gmra.mrb[0].mxu1 %vm405_vm1, %v1951_v14 }
  0x9c   : > { %1318 = vmatprep.mubr.msk.f32.mxu1 %vm405_vm1, %v1954_v15  ;;  %p1573_p10 = pneg %p1572_p6  ;;  %p1579_p3 = por %p1578_p5, %p1577_p4 }
  0x9d   : > { %1313 = vmatmul.mubr.msk.f32.vlgmr.msra.gmra.mrb[2].mxu0 %vm405_vm1, %v1957_v16 }
  0x9e   : > { %p1580_p7 = pnand %p1579_p3, %p1573_p10 }
  0x9f   : > { %1319 = vmatmul.mubr.msk.f32.gmra.mrb[2].mxu1 %vm405_vm1, %v1964_v17 }
  0xa0   : > { %1321 = vmatprep.mubr.msk.f32.mxu1 %vm405_vm1, %v1969_v18 }
  0xa3   : > { %1322 = vmatmul.mubr.msk.f32.gmra.mrb[4].mxu1 %vm405_vm1, %v1976_v19 }
 0x168   : > { %v397_v27 = vpop.f32.mrb[0].mxu0 }
 0x169   : > { %v398_v28 = vadd.f32 %v1266_v25, %v397_v27  ;;  %v1303_v29 = vpop.f32.mrb[1].mxu0 }
 0x16b   : > { %v536_v30 = vcombine.high %v398_v28, %v398_v28  ;;  %v543_v31 = vrot.slane %v398_v28, %v542_v26 }
 0x16d   : > { %v550_v33 = vrot.slane %v536_v30, %v542_v26  ;;  %v551_v34 = vcombine.high %v543_v31, %v543_v31  ;;  %v559_v35 = vrot.slane %v543_v31, %v542_v26 }
 0x16e   : > { %v1317_v36 = vpop.f32.mrb[0].mxu1 }
 0x16f   : > { %v573_v37 = vrot.slane %v551_v34, %v542_v26  ;;  %v506_v38 = vpop.f32.mrb[1].mxu1  ;;  %v581_v39 = vcombine.high %v559_v35, %v559_v35  ;;  %v588_v40 = vrot.slane %v559_v35, %v1988_v32  ;;  %v552_v41 = vcombine.high %v550_v33, %v550_v33 }
 0x170   : > { %v1314_v42 = vpop.f32.mrb[2].mxu0  ;;  %v566_v43 = vrot.slane %v550_v33, %v542_v26 }
 0x171   : > { %v583_v44 = vcombine.high %v573_v37, %v573_v37  ;;  %v592_v45 = vrot.slane %v573_v37, %v1988_v32  ;;  %v596_v46 = vrot.slane %v581_v39, %v1988_v32  ;;  %v496_v47 = vpop.f32.mrb[3].mxu0  ;;  %v580_v48 = vrot.slane %v552_v41, %v542_v26 }
 0x172   : > { %v625_v49 = vadd.f32 %v588_v40, %v496_v47  ;;  %v1320_v50 = vpop.f32.mrb[2].mxu1  ;;  %v604_v51 = vrot.slane %v566_v43, %v1988_v32  ;;  %v582_v52 = vcombine.high %v566_v43, %v566_v43  ;;  %v2010_v40 = vand.u32 127, %v540_v22 }
 0x173   : > { %v600_v53 = vrot.slane %v583_v44, %v1988_v32  ;;  %v626_v54 = vadd.f32 %v1314_v42, %v592_v45  ;;  %v627_v55 = vadd.f32 %v596_v46, %v506_v38  ;;  %v608_v56 = vrot.slane %v580_v48, %v1988_v32  ;;  %v516_v57 = vpop.f32.mrb[3].mxu1 }
 0x174   : > { %1420 = vtanh.f32 %v625_v49  ;;  %v629_v58 = vadd.f32 %v604_v51, %v516_v57  ;;  %v584_v59 = vcombine.high %v580_v48, %v580_v48  ;;  %v612_v0 = vrot.slane %v582_v52, %v1988_v32 }
 0x175   : > { %v628_v60 = vadd.f32 %v1317_v36, %v600_v53  ;;  %1422 = vtanh.f32 %v626_v54  ;;  %v630_v61 = vadd.f32 %v1320_v50, %v608_v56  ;;  %v2014_v42 = vsub.s32 %v2010_v40, %v1981_v24 }
 0x176   : > { %1424 = vtanh.f32 %v627_v55  ;;  %v1323_v62 = vpop.f32.mrb[4].mxu1  ;;  %v616_v63 = vrot.slane %v584_v59, %v1988_v32 }
 0x177   : > { %1426 = vtanh.f32 %v628_v60  ;;  %v526_v1 = vpop.f32.mrb[5].mxu1 }
 0x178   : > { %v632_v2 = vadd.f32 %v1323_v62, %v616_v63  ;;  %v631_v3 = vadd.f32 %v612_v0, %v526_v1  ;;  %1428 = vtanh.f32 %v629_v58  ;;  %v1660_v1 = vmov 0  }
 0x179   : > { %1430 = vtanh.f32 %v630_v61  ;;  %1419 = vset.pattern.permute.xlu0 %v1660_v1  ;;  %1418 = vset.pattern.permute.xlu1 %v1660_v1 }
 0x17a   : > { %1432 = vtanh.f32 %v631_v3  ;;  %v749_v3 = vsub.s32 2, %v1981_v24 }
 0x17b   : > { %1434 = vtanh.f32 %v632_v2  ;;  %v745_v2 = vsub.s32 1, %v1981_v24 }
 0x17e   : > { %v1421_v5 = vpop.eup %1420 }
 0x17f   : > { %v1423_v6 = vpop.eup %1422  ;;  %v645_v7 = vmul.f32 %v1421_v5, %v1276_v4 }
 0x180   : > { %v1425_v8 = vpop.eup %1424  ;;  %v646_v20 = vmul.f32 %v1423_v6, %v1276_v4 }
 0x181   : > { %v1427_v9 = vpop.eup %1426  ;;  %v653_v11 = vsel %vm405_vm1, %v645_v7, 0.0  ;;  %v647_v12 = vmul.f32 %v1425_v8, %v1276_v4 }
 0x182   : > { %654 = vadd.xlane.f32.xlu0 %v653_v11  ;;  %v1429_v21 = vpop.eup %1428  ;;  %v648_v25 = vmul.f32 %v1427_v9, %v1276_v4  ;;  %v656_v27 = vsel %vm405_vm1, %v646_v20, 0.0  ;;  %v757_v9 = vsub.s32 4, %v1981_v24 }
 0x183   : > { %v659_v23 = vsel %vm405_vm1, %v647_v12, 0.0  ;;  %v1431_v26 = vpop.eup %1430  ;;  %v649_v28 = vmul.f32 %v1429_v21, %v1276_v4 }
 0x184   : > { %660 = vadd.xlane.f32.xlu1 %v659_v23  ;;  %v1433_v29 = vpop.eup %1432  ;;  %v662_v30 = vsel %vm405_vm1, %v648_v25, 0.0  ;;  %v650_v31 = vmul.f32 %v1431_v26, %v1276_v4  ;;  %v761_v26 = vsub.s32 5, %v1981_v24 }
 0x185   : > { %v1435_v33 = vpop.eup %1434  ;;  %v665_v34 = vsel %vm405_vm1, %v649_v28, 0.0  ;;  %v651_v35 = vmul.f32 %v1433_v29, %v1276_v4 }
 0x186   : > { %657 = vadd.xlane.f32.xlu0 %v656_v27  ;;  %v668_v36 = vsel %vm405_vm1, %v650_v31, 0.0  ;;  %v652_v37 = vmul.f32 %v1435_v33, %v1276_v4  ;;  %v753_v4 = vsub.s32 3, %v1981_v24 }
 0x187   : > { %v671_v38 = vsel %vm405_vm1, %v651_v35, 0.0  ;;  %v769_v35 = vsub.s32 7, %v1981_v24 }
 0x188   : > { %663 = vadd.xlane.f32.xlu1 %v662_v30  ;;  %v674_v39 = vsel %vm405_vm1, %v652_v37, 0.0  ;;  %v765_v30 = vsub.s32 6, %v1981_v24 }
 0x18a   : > { %666 = vadd.xlane.f32.xlu0 %v665_v34 }
 0x18c   : > { %669 = vadd.xlane.f32.xlu1 %v668_v36 }
 0x18e   : > { %672 = vadd.xlane.f32.xlu0 %v671_v38 }
 0x190   : > { %675 = vadd.xlane.f32.xlu1 %v674_v39 }
 0x20f   : > { %v655_v41 = vpop.xlane.xlu0 %654 }
 0x210   : > { %v690_v45 = vrot.slane %v655_v41, %v2014_v42 }
 0x211   : > { %v661_v43 = vpop.xlane.xlu1 %660 }
 0x212   : > { %v698_v47 = vrot.slane %v661_v43, %v2014_v42 }
 0x213   : > { %v658_v44 = vpop.xlane.xlu0 %657 }
 0x214   : > { %v694_v46 = vrot.slane %v658_v44, %v2014_v42 }
 0x215   : > { %v664_v48 = vpop.xlane.xlu1 %663 }
 0x216   : > { %v720_v22 = vsel %vm719_vm3, %v694_v46, %v690_v45  ;;  %v702_v49 = vrot.slane %v664_v48, %v2014_v42 }
 0x217   : > { %v722_v50 = vsel %vm721_vm4, %v698_v47, %v720_v22  ;;  %v667_v51 = vpop.xlane.xlu0 %666 }
 0x218   : > { %v724_v52 = vsel %vm723_vm5, %v702_v49, %v722_v50  ;;  %v706_v53 = vrot.slane %v667_v51, %v2014_v42 }
 0x219   : > { %v670_v54 = vpop.xlane.xlu1 %669 }
 0x21a   : > { %v726_v55 = vsel %vm725_vm6, %v706_v53, %v724_v52  ;;  %v710_v56 = vrot.slane %v670_v54, %v2014_v42 }
 0x21b   : > { %v673_v57 = vpop.xlane.xlu0 %672 }
 0x21c   : > { %v714_v58 = vrot.slane %v673_v57, %v2014_v42  ;;  %v728_v60 = vsel %vm727_vm7, %v710_v56, %v726_v55 }
 0x21d   : > { %v676_v59 = vpop.xlane.xlu1 %675 }
 0x21e   : > { %v718_v61 = vrot.slane %v676_v59, %v2014_v42  ;;  %v730_v62 = vsel %vm729_vm8, %v714_v58, %v728_v60 }
 0x220   : > { %v732_v63 = vsel %vm731_vm9, %v718_v61, %v730_v62 }
 0x221   : > { %v735_v0 = vsel %vm734_vm10, %v732_v63, -inf }
 0x222   : > { %736 = vmax.xlane.f32.xlu0 %v735_v0 }
 0x2af   : > { %v737_v5 = vpop.xlane.xlu0 %736 }
 0x2b0   : > { %v742_v6 = vrot.slane %v737_v5, %v1988_v32  ;;  %v746_v7 = vrot.slane %v737_v5, %v745_v2  ;;  %v750_v8 = vrot.slane %v737_v5, %v749_v3  ;;  %v754_v11 = vrot.slane %v737_v5, %v753_v4 }
 0x2b1   : > { %v758_v27 = vrot.slane %v737_v5, %v757_v9  ;;  %v762_v31 = vrot.slane %v737_v5, %v761_v26  ;;  %v766_v36 = vrot.slane %v737_v5, %v765_v30 }
 0x2b2   : > { %v779_v12 = vsub.f32 %v655_v41, %v742_v6  ;;  %v780_v20 = vsub.f32 %v658_v44, %v746_v7  ;;  %v781_v21 = vsub.f32 %v661_v43, %v750_v8  ;;  %v782_v28 = vsub.f32 %v664_v48, %v754_v11 }
 0x2b3   : > { %v783_v33 = vsub.f32 %v667_v51, %v758_v27  ;;  %v784_v37 = vsub.f32 %v670_v54, %v762_v31  ;;  %v770_v43 = vrot.slane %v737_v5, %v769_v35  ;;  %v785_v44 = vsub.f32 %v673_v57, %v766_v36 }
 0x2b4   : > { %v787_v23 = vmul.f32 1.442695, %v779_v12  ;;  %v789_v25 = vmul.f32 1.442695, %v780_v20  ;;  %v791_v29 = vmul.f32 1.442695, %v781_v21 }
 0x2b5   : > { %v793_v34 = vmul.f32 1.442695, %v782_v28  ;;  %v795_v38 = vmul.f32 1.442695, %v783_v33  ;;  %v797_v45 = vmul.f32 1.442695, %v784_v37  ;;  %v786_v47 = vsub.f32 %v676_v59, %v770_v43 }
 0x2b6   : > { %1436 = vpow2.f32 %v787_v23  ;;  %v799_v48 = vmul.f32 1.442695, %v785_v44 }
 0x2b7   : > { %1438 = vpow2.f32 %v789_v25  ;;  %v801_v49 = vmul.f32 1.442695, %v786_v47 }
 0x2b8   : > { %1440 = vpow2.f32 %v791_v29 }
 0x2b9   : > { %1442 = vpow2.f32 %v793_v34 }
 0x2ba   : > { %1444 = vpow2.f32 %v795_v38 }
 0x2bb   : > { %1446 = vpow2.f32 %v797_v45 }
 0x2bc   : > { %1448 = vpow2.f32 %v799_v48 }
 0x2bd   : > { %1450 = vpow2.f32 %v801_v49 }
 0x2c0   : > { %v2052_v39 = vpop.eup %1436 }
 0x2c1   : > { %v2054_v41 = vpop.eup %1438  ;;  %812 = vperm.xlu1 %1418, %v2052_v39  }
 0x2c2   : > { %815 = vperm.xlu0 %1419, %v2054_v41   ;;  %v2060_v46 = vpop.eup %1440 }
 0x2c3   : > { %v2063_v22 = vpop.eup %1442 }
 0x2c4   : > { %v2066_v50 = vpop.eup %1444 }
 0x2c5   : > { %818 = vperm.xlu1 %1418, %v2060_v46   ;;  %v2069_v51 = vpop.eup %1446 }
 0x2c6   : > { %v2072_v52 = vpop.eup %1448 }
 0x2c7   : > { %v2075_v53 = vpop.eup %1450 }
 0x2c9   : > { %821 = vperm.xlu1 %1418, %v2063_v22  }
 0x2cd   : > { %824 = vperm.xlu1 %1418, %v2066_v50  }
 0x2d1   : > { %827 = vperm.xlu1 %1418, %v2069_v51  }
 0x2d5   : > { %830 = vperm.xlu1 %1418, %v2072_v52  }
 0x2d9   : > { %833 = vperm.xlu1 %1418, %v2075_v53  }
 0x340   : > { %v813_v54 = vpop.permute.xlu1 %812 }
 0x341   : > { %v816_v58 = vpop.permute.xlu0 %815  ;;  %v838_v61 = vrot.slane %v813_v54, %v2014_v42  ;;  %v937_v31 = vmul.f32 %v813_v54, %v1946_v13 }
 0x342   : > { %v842_v60 = vrot.slane %v816_v58, %v2014_v42  ;;  %v938_v29 = vmul.f32 %v816_v58, %v1957_v16 }
 0x343   : > { %v945_v43 = vsel %vm405_vm1, %v937_v31, 0.0 }
 0x344   : > { %v819_v55 = vpop.permute.xlu1 %818  ;;  %v867_v5 = vsel %vm719_vm3, %v842_v60, %v838_v61  ;;  %v952_v38 = vsel %vm405_vm1, %v938_v29, 0.0 }
 0x345   : > { %v846_v62 = vrot.slane %v819_v55, %v2014_v42  ;;  %v939_v33 = vmul.f32 %v819_v55, %v1941_v10  ;;  %v953_v45 = vrot.slane %v952_v38, 4 }
 0x347   : > { %v868_v7 = vsel %vm721_vm4, %v846_v62, %v867_v5  ;;  %v959_v44 = vsel %vm405_vm1, %v939_v33, 0.0 }
 0x348   : > { %v822_v56 = vpop.permute.xlu1 %821  ;;  %v960_v47 = vrot.slane %v959_v44, 4 }
 0x349   : > { %v850_v63 = vrot.slane %v822_v56, %v2014_v42  ;;  %v940_v34 = vmul.f32 %v822_v56, %v1951_v14  ;;  %v954_v56 = vadd.f32 %v953_v45, %v952_v38 }
 0x34a   : > { %v961_v58 = vadd.f32 %v960_v47, %v959_v44 }
 0x34b   : > { %v869_v11 = vsel %vm723_vm5, %v850_v63, %v868_v7  ;;  %v966_v16 = vsel %vm405_vm1, %v940_v34, 0.0 }
 0x34c   : > { %v825_v57 = vpop.permute.xlu1 %824  ;;  %v962_v5 = vrot.slane %v961_v58, 2 }
 0x34d   : > { %v854_v0 = vrot.slane %v825_v57, %v2014_v42  ;;  %v941_v36 = vmul.f32 %v825_v57, %v1954_v15 }
 0x34f   : > { %v870_v12 = vsel %vm725_vm6, %v854_v0, %v869_v11  ;;  %v973_v13 = vsel %vm405_vm1, %v941_v36, 0.0 }
 0x350   : > { %v828_v59 = vpop.permute.xlu1 %827  ;;  %v974_v48 = vrot.slane %v973_v13, 4 }
 0x351   : > { %v858_v6 = vrot.slane %v828_v59, %v2014_v42 }
 0x352   : > { %v975_v60 = vadd.f32 %v974_v48, %v973_v13 }
 0x353   : > { %v871_v23 = vsel %vm727_vm7, %v858_v6, %v870_v12 }
 0x354   : > { %v831_v1 = vpop.permute.xlu1 %830  ;;  %v976_v7 = vrot.slane %v975_v60, 2 }
 0x355   : > { %v862_v8 = vrot.slane %v831_v1, %v2014_v42  ;;  %v943_v37 = vmul.f32 %v831_v1, %v1969_v18  ;;  %v967_v18 = vrot.slane %v966_v16, 4  ;;  %v955_v1 = vrot.slane %v954_v56, 2 }
 0x357   : > { %v872_v25 = vsel %vm729_vm8, %v862_v8, %v871_v23  ;;  %v987_v14 = vsel %vm405_vm1, %v943_v37, 0.0  ;;  %v963_v23 = vadd.f32 %v962_v5, %v961_v58 }
 0x358   : > { %v834_v20 = vpop.permute.xlu1 %833  ;;  %v988_v54 = vrot.slane %v987_v14, 4 }
 0x359   : > { %v866_v21 = vrot.slane %v834_v20, %v2014_v42  ;;  %v942_v42 = vmul.f32 %v828_v59, %v1964_v17  ;;  %v944_v15 = vmul.f32 %v834_v20, %v1976_v19  ;;  %v946_v17 = vrot.slane %v945_v43, 4 }
 0x35a   : > { %v968_v59 = vadd.f32 %v967_v18, %v966_v16  ;;  %v989_v62 = vadd.f32 %v988_v54, %v987_v14  ;;  %v956_v20 = vadd.f32 %v955_v1, %v954_v56  ;;  %v964_v36 = vrot.slane %v963_v23, 1 }
 0x35b   : > { %v873_v27 = vsel %vm731_vm9, %v866_v21, %v872_v25  ;;  %v980_v10 = vsel %vm405_vm1, %v942_v42, 0.0  ;;  %v994_v55 = vsel %vm405_vm1, %v944_v15, 0.0  ;;  %v947_v57 = vadd.f32 %v946_v17, %v945_v43 }
 0x35c   : > { %v875_v28 = vsel %vm734_vm10, %v873_v27, 0.0  ;;  %v981_v49 = vrot.slane %v980_v10, 4  ;;  %v995_v63 = vrot.slane %v994_v55, 4  ;;  %v969_v6 = vrot.slane %v968_v59, 2 }
 0x35d   : > { %876 = vadd.xlane.f32.xlu1 %v875_v28  ;;  %v948_v19 = vrot.slane %v947_v57, 2  ;;  %v990_v11 = vrot.slane %v989_v62, 2  ;;  %v977_v27 = vadd.f32 %v976_v7, %v975_v60  ;;  %v957_v33 = vrot.slane %v956_v20, 1 }
 0x35e   : > { %v982_v61 = vadd.f32 %v981_v49, %v980_v10  ;;  %v996_v12 = vadd.f32 %v995_v63, %v994_v55  ;;  %v970_v25 = vadd.f32 %v969_v6, %v968_v59  ;;  %v965_v45 = vadd.f32 %v964_v36, %v963_v23 }
 0x35f   : > { %v949_v21 = vadd.f32 %v948_v19, %v947_v57  ;;  %v991_v29 = vadd.f32 %v990_v11, %v989_v62  ;;  %v978_v37 = vrot.slane %v977_v27, 1  ;;  %v958_v14 = vadd.f32 %v957_v33, %v956_v20 }
 0x360   : > { %v983_v8 = vrot.slane %v982_v61, 2  ;;  %v997_v31 = vrot.slane %v996_v12, 2  ;;  %v971_v42 = vrot.slane %v970_v25, 1 }
 0x361   : > { %v950_v34 = vrot.slane %v949_v21, 1  ;;  %v992_v44 = vrot.slane %v991_v29, 1  ;;  %v979_v47 = vadd.f32 %v978_v37, %v977_v27 }
 0x362   : > { %v984_v28 = vadd.f32 %v983_v8, %v982_v61  ;;  %v998_v16 = vadd.f32 %v997_v31, %v996_v12  ;;  %v972_v17 = vadd.f32 %v971_v42, %v970_v25 }
 0x363   : > { %v951_v15 = vadd.f32 %v950_v34, %v949_v21  ;;  %v993_v49 = vadd.f32 %v992_v44, %v991_v29 }
 0x364   : > { %v985_v38 = vrot.slane %v984_v28, 1  ;;  %v999_v54 = vrot.slane %v998_v16, 1 }
 0x366   : > { %v986_v18 = vadd.f32 %v985_v38, %v984_v28  ;;  %v1000_v6 = vadd.f32 %v999_v54, %v998_v16 }
 0x3ea   : > { %v877_v0 = vpop.xlane.xlu1 %876 }
 0x3eb   : > { %1452 = vrcp.f32 %v877_v0 }
 0x3f5   : > { %v1453_v43 = vpop.eup %1452 }
 0x3f6   : > { %v884_v13 = vrot.slane %v1453_v43, %v1988_v32  ;;  %v888_v10 = vrot.slane %v1453_v43, %v745_v2  ;;  %v892_v56 = vrot.slane %v1453_v43, %v749_v3  ;;  %v1001_v32 = vrot.slane %v1453_v43, 1 }
 0x3f7   : > { %v1002_v57 = vrot.slane %v1453_v43, 2  ;;  %v1003_v58 = vrot.slane %v1453_v43, 3  ;;  %v1004_v2 = vrot.slane %v1453_v43, 4  ;;  %v1005_v59 = vrot.slane %v1453_v43, 5 }
 0x3f8   : > { %v921_v48 = vmul.f32 %v2052_v39, %v884_v13  ;;  %v922_v55 = vmul.f32 %v2054_v41, %v888_v10  ;;  %v1006_v60 = vrot.slane %v1453_v43, 6  ;;  %v1007_v61 = vrot.slane %v1453_v43, 7 }
 0x3f9   : > { %v1016_v62 = vmul.f32 %v1453_v43, %v951_v15  ;;  %v1017_v63 = vmul.f32 %v1001_v32, %v958_v14  ;;  %v1018_v0 = vmul.f32 %v1002_v57, %v965_v45  ;;  %v1019_v1 = vmul.f32 %v1003_v58, %v972_v17 }
 0x3fa   : > { %1056 = vperm.xlu0 %1419, %v921_v48   ;;  %v1020_v39 = vmul.f32 %v1004_v2, %v979_v47  ;;  %v1021_v19 = vmul.f32 %v1005_v59, %v986_v18  ;;  %v1022_v5 = vmul.f32 %v1006_v60, %v993_v49  ;;  %v896_v3 = vrot.slane %v1453_v43, %v753_v4 }
 0x3fb   : > { %v1032_v41 = vrot.slane %v1017_v63, 7  ;;  %v1034_v7 = vrot.slane %v1018_v0, 6  ;;  %v923_v8 = vmul.f32 %v2060_v46, %v892_v56  ;;  %v1023_v11 = vmul.f32 %v1007_v61, %v1000_v6 }
 0x3fc   : > { %v1036_v20 = vrot.slane %v1019_v1, 5  ;;  %v1038_v23 = vrot.slane %v1020_v39, 4  ;;  %v1040_v27 = vrot.slane %v1021_v19, 3  ;;  %v1042_v29 = vrot.slane %v1022_v5, 2 }
 0x3fd   : > { %v1033_v12 = vsel %vm719_vm3, %v1032_v41, %v1016_v62  ;;  %v924_v31 = vmul.f32 %v2063_v22, %v896_v3  ;;  %v900_v4 = vrot.slane %v1453_v43, %v757_v9  ;;  %v1044_v33 = vrot.slane %v1023_v11, 1 }
 0x3fe   : > { %1059 = vperm.xlu0 %1419, %v922_v55   ;;  %v1035_v21 = vsel %vm721_vm4, %v1034_v7, %v1033_v12  ;;  %v904_v37 = vrot.slane %v1453_v43, %v761_v26  ;;  %v908_v22 = vrot.slane %v1453_v43, %v765_v30  ;;  %v912_v44 = vrot.slane %v1453_v43, %v769_v35 }
 0x3ff   : > { %v1037_v25 = vsel %vm723_vm5, %v1036_v20, %v1035_v21  ;;  %v925_v42 = vmul.f32 %v2066_v50, %v900_v4  ;;  %v1079_v14 = vadd.s32 4294967264, %v2010_v40 }
 0x400   : > { %v1039_v28 = vsel %vm725_vm6, %v1038_v23, %v1037_v25  ;;  %v926_v38 = vmul.f32 %v2069_v51, %v904_v37  ;;  %v927_v9 = vmul.f32 %v2072_v52, %v908_v22  ;;  %v928_v16 = vmul.f32 %v2075_v53, %v912_v44 }
 0x401   : > { %v1041_v46 = vsel %vm727_vm7, %v1040_v27, %v1039_v28  ;;  %v1082_v15 = vsub.s32 %v1079_v14, %v1981_v24 }
 0x402   : > { %1062 = vperm.xlu0 %1419, %v923_v8   ;;  %v1043_v34 = vsel %vm729_vm8, %v1042_v29, %v1041_v46 }
 0x403   : > { %v1045_v36 = vsel %vm731_vm9, %v1044_v33, %v1043_v34 }
 0x406   : > { %1065 = vperm.xlu0 %1419, %v924_v31  }
 0x40a   : > { %1068 = vperm.xlu0 %1419, %v925_v42  }
 0x40e   : > { %1071 = vperm.xlu0 %1419, %v926_v38  }
 0x412   : > { %1074 = vperm.xlu0 %1419, %v927_v9  }
 0x416   : > { %1077 = vperm.xlu0 %1419, %v928_v16  }
 0x479   : > { %v1057_v50 = vpop.permute.xlu0 %1056 }
 0x47a   : > { %v1083_v17 = vrot.slane %v1057_v50, %v1082_v15 }
 0x47d   : > { %v1060_v13 = vpop.permute.xlu0 %1059 }
 0x47e   : > { %v1087_v45 = vrot.slane %v1060_v13, %v1082_v15 }
 0x480   : > { %v1112_v53 = vsel %vm719_vm3, %v1087_v45, %v1083_v17 }
 0x481   : > { %v1063_v10 = vpop.permute.xlu0 %1062 }
 0x482   : > { %v1091_v52 = vrot.slane %v1063_v10, %v1082_v15 }
 0x484   : > { %v1113_v48 = vsel %vm721_vm4, %v1091_v52, %v1112_v53 }
 0x485   : > { %v1066_v26 = vpop.permute.xlu0 %1065 }
 0x486   : > { %v1095_v35 = vrot.slane %v1066_v26, %v1082_v15 }
 0x488   : > { %v1114_v40 = vsel %vm723_vm5, %v1095_v35, %v1113_v48 }
 0x489   : > { %v1069_v51 = vpop.permute.xlu0 %1068 }
 0x48a   : > { %v1099_v43 = vrot.slane %v1069_v51, %v1082_v15 }
 0x48c   : > { %v1115_v24 = vsel %vm725_vm6, %v1099_v43, %v1114_v40 }
 0x48d   : > { %v1072_v30 = vpop.permute.xlu0 %1071 }
 0x48e   : > { %v1103_v18 = vrot.slane %v1072_v30, %v1082_v15 }
 0x490   : > { %v1116_v55 = vsel %vm727_vm7, %v1103_v18, %v1115_v24 }
 0x491   : > { %v1075_v47 = vpop.permute.xlu0 %1074 }
 0x492   : > { %v1107_v49 = vrot.slane %v1075_v47, %v1082_v15 }
 0x494   : > { %v1117_v32 = vsel %vm729_vm8, %v1107_v49, %v1116_v55 }
 0x495   : > { %v1078_v54 = vpop.permute.xlu0 %1077 }
 0x496   : > { %v1111_v56 = vrot.slane %v1078_v54, %v1082_v15 }
 0x498   : > { %v1118_v57 = vsel %vm731_vm9, %v1111_v56, %v1117_v32 }
 0x499   : > { %v1120_v58 = vsel %vm405_vm1, %v1045_v36, %v1118_v57 }
 0x49a   : > { %v1122_v2 = vsel %vm1121_vm11, %v1120_v58, 0.0 }
 0x49b   : > { %1123 = vst [vmem:[%s308_s11] sm:$0xff] %v1122_v2 }
 0x49c   : > { %1583 = shalt.err (!%p1580_p7)
}
 0x49d   : > { %s1584_s30 = scalar_lea.hbm %s2156_s28, 128  ;;  %s1588_s24 = scalar_lea.hbm %s2205_s5, 256 }
 0x49e   : > { %p1585_p9 = scmp.ne.s32.totalorder %s2156_s28, %s1584_s30  ;;  %p1589_p11 = scmp.lt.u32.totalorder %s2156_s28, %s2205_s5 }
 0x49f   : > { %p1590_p2 = scmp.lt.u32.totalorder %s1588_s24, %s1584_s30  ;;  %p1592_p1 = scmp.lt.u32.totalorder %s1584_s30, %s2156_s28 }
 0x4a0   : > { %p1586_p0 = pnand %p1585_p9, %p2227_p13 }
 0x4a1   : > { %p1591_p12 = por %p1590_p2, %p1589_p11 }
 0x4a2   : > { %p1587_p8 = pneg %p1586_p0 }
 0x4a3   : > { %p1593_p6 = por %p1592_p1, %p1591_p12 }
 0x4a5   : > { %p1594_p10 = pnand %p1593_p6, %p1587_p8 }
 0x4a7   : > { %1597 = shalt.err (!%p1594_p10)
}
 0x4a8   : > { %1351 = dma.vmem_to_hbm [thread:$0]  (%p2227_p13), %s2158_s6, 128, %s2156_s28, %s1125_s22  }
 0x4a9 PF: > { %s1150_s14 = sand.u32 1, %s1636_s18   ;;  %p2228_p4 = scmp.ne.s32.totalorder %s2213_s25, 0 }
 0x4aa   : > { %p2229_p5 = scmp.ge.s32.totalorder %s1648_s21, 2  ;;  %s1151_s8 = scalar_lea.sflag [#allocation4], %s1150_s14 }
 0x4ac   : > { %p1368_p3 = pnand %p2229_p5, %p2228_p4 }
 0x4ae   : > { %1631 = dma.done.wait (!%p1368_p3), %s1151_s8, 128  }
 0x4af   : > { %1633 = vsyncadd (!%p1368_p3), %s1151_s8, 4294967168  ;;  %p22_p7 = scmp.ge.s32.totalorder %s1808_s29, 4   ;;  %s2230_s18 = smov %s1640_s19 }
 0x4b0   : > { %s2231_s19 = smov %s1644_s20  ;;  %s2232_s20 = smov %s1824_s27 }
 0x4b1   : > { %s2233_s21 = smov %s1808_s29  ;;  %24 = sbr.rel (!%p22_p7) target bundleno = 10 (0xa), region = 106 }
 0x4b8   :  { %1156 = vsyncpa [#allocation3], 1 }
 0x4b9   :  { %1158 = vsyncpa [#allocation3 + $0x1], 1 }
 0x4ba   :  { %1159 = vsyncpa [#allocation6], 1 }
 0x4bb   :  { %1161 = vsyncpa [#allocation6 + $0x1], 1 }
 0x4bc   :  { %1162 = vsyncpa [#allocation9], 1 }
 0x4bd   :  { %1163 = vsyncpa [#allocation4], 1 }
 0x4be   :  { %1165 = vsyncpa [#allocation4 + $0x1], 1 }

</bundles_post_ra>
